<compile_context>
chip_gen: v6e
topology: v6e:2x2x1
jax: 0.10.0
libtpu: 0.0.40
codegen_flags: <defaults>
</compile_context>

<pallas_src>
import functools

import jax
import jax.numpy as jnp
import numpy as np
from jax import lax
from jax.experimental import pallas as pl
from jax.experimental.pallas import tpu as pltpu


def _mbart_attn_kernel(hs_ref, hsq_ref, wq_ref, bq_ref, wkv_ref, bkv_ref,
                       wo_ref, bo_ref, out_ref, *rest,
                       num_heads, head_dim, output_attentions):
    # hs_ref  block: (1, S,  E)  -- full source sequence (keys/values)
    # hsq_ref block: (1, TQ, E)  -- this step's query tile
    if output_attentions:
        aw_ref, ctx_ref = rest
    else:
        (ctx_ref,) = rest

    E = num_heads * head_dim
    hs = hs_ref[0]                                    # (S,  E)
    hs_q = hsq_ref[0]                                 # (TQ, E)

    # Projections. Weights are pre-transposed in the wrapper (x @ W == torch
    # x @ W.T); scaling is already folded into wq/bq; k and v share one fused
    # lane-dense (E, 2E) matmul.
    q = jnp.dot(hs_q, wq_ref[...], preferred_element_type=jnp.float32) + bq_ref[...]
    kv = jnp.dot(hs, wkv_ref[...], preferred_element_type=jnp.float32) + bkv_ref[...]

    for h in range(num_heads):                        # static loop over heads
        lo = h * head_dim
        qh = q[:, lo:lo + head_dim]                   # (TQ, D)
        kh = kv[:, lo:lo + head_dim]                  # (S,  D)
        vh = kv[:, E + lo:E + lo + head_dim]          # (S,  D)

        # scores = qh @ kh^T -> (TQ, S), contract over head_dim (no transpose)
        s = lax.dot_general(qh, kh, (((1,), (1,)), ((), ())),
                            preferred_element_type=jnp.float32)

        # numerically-stable softmax over the source axis
        s = s - jnp.max(s, axis=-1, keepdims=True)
        e = jnp.exp(s)
        denom = jnp.sum(e, axis=-1, keepdims=True)
        r = pl.reciprocal(denom, approx=True)         # EUP slot
        r = r * (2.0 - denom * r)                     # one Newton step -> f32 exact
        p = e * r

        if output_attentions:
            aw_ref[0, h] = p.astype(aw_ref.dtype)     # (TQ, S), lane-dense in S

        # write this head's context directly into its lane slice of the
        # (TQ, E) scratch -- no lane-axis concatenate.
        ctx_ref[:, lo:lo + head_dim] = jnp.dot(
            p, vh, preferred_element_type=jnp.float32)

    out = jnp.dot(ctx_ref[...], wo_ref[...],
                  preferred_element_type=jnp.float32) + bo_ref[...]
    out_ref[0] = out.astype(out_ref.dtype)


def mbart_attention(hidden_states, params, *, num_heads,
                    output_attentions=False, q_block=128):
    """hidden_states: [B, T, E]. Returns (attn_output, attn_weights_or_None)."""
    B, T, E = hidden_states.shape
    head_dim = E // num_heads
    assert head_dim * num_heads == E
    scaling = head_dim ** -0.5

    # Query tiling: bounds per-step VMEM (scores are (H, TQ, T) worth of work
    # per step) and provides a second "parallel" grid axis for v7x.
    TQ = T if T <= q_block else q_block
    assert T % TQ == 0, "tgt_len must be a multiple of the query tile"
    QB = T // TQ

    # Wrapper-side (one-time) weight prep:
    #   * fold softmax scaling into q weight + bias
    #   * fuse k/v weights into one (E, 2E) matmul, biases into (1, 2E)
    wq_s = params["wq"].T * scaling
    bq_s = (params["bq"] * scaling).reshape(1, E)
    wkv = jnp.concatenate([params["wk"].T, params["wv"].T], axis=1)   # (E, 2E)
    bkv = jnp.concatenate([params["bk"], params["bv"]]).reshape(1, 2 * E)
    wo_t = params["wo"].T
    bo = params["bo"].reshape(1, E)

    kernel = functools.partial(_mbart_attn_kernel, num_heads=num_heads,
                               head_dim=head_dim,
                               output_attentions=output_attentions)

    const = lambda shape: pl.BlockSpec(shape, lambda b, qi: (0,) * len(shape))
    in_specs = [
        pl.BlockSpec((1, T, E), lambda b, qi: (b, 0, 0)),    # full seq (k/v src)
        pl.BlockSpec((1, TQ, E), lambda b, qi: (b, qi, 0)),  # query tile
        const((E, E)), const((1, E)),                        # q_proj (scaled)
        const((E, 2 * E)), const((1, 2 * E)),                # fused k/v proj
        const((E, E)), const((1, E)),                        # out_proj
    ]

    out_shapes = [jax.ShapeDtypeStruct((B, T, E), hidden_states.dtype)]
    out_specs = [pl.BlockSpec((1, TQ, E), lambda b, qi: (b, qi, 0))]
    if output_attentions:
        out_shapes.append(jax.ShapeDtypeStruct((B, num_heads, T, T), jnp.float32))
        out_specs.append(
            pl.BlockSpec((1, num_heads, TQ, T), lambda b, qi: (b, 0, qi, 0)))

    outs = pl.pallas_call(
        kernel,
        out_shape=tuple(out_shapes),
        grid_spec=pltpu.PrefetchScalarGridSpec(
            num_scalar_prefetch=0,
            grid=(B, QB),
            in_specs=in_specs,
            out_specs=tuple(out_specs),
            scratch_shapes=[pltpu.VMEM((TQ, E), jnp.float32)],   # ctx scratch
        ),
        compiler_params=pltpu.CompilerParams(
            dimension_semantics=("parallel", "parallel")),
    )(hidden_states, hidden_states, wq_s, bq_s, wkv, bkv, wo_t, bo)

    if output_attentions:
        attn_out, attn_w = outs
        return attn_out, attn_w
    (attn_out,) = outs
    return attn_out, None


def _reference(hidden_states, params, *, num_heads):
    """Pure-JAX reference mirroring the PyTorch forward (self-attn path)."""
    B, T, E = hidden_states.shape
    D = E // num_heads
    scaling = D ** -0.5

    def lin(x, w, b):
        return x @ w.T + b

    q = lin(hidden_states, params["wq"], params["bq"]) * scaling
    k = lin(hidden_states, params["wk"], params["bk"])
    v = lin(hidden_states, params["wv"], params["bv"])

    def shape(x):  # (B,T,E) -> (B,H,T,D)
        return x.reshape(B, T, num_heads, D).transpose(0, 2, 1, 3)

    q, k, v = shape(q), shape(k), shape(v)
    w = jnp.einsum("bhtd,bhsd->bhts", q, k)
    w = jax.nn.softmax(w, axis=-1)
    ctx = jnp.einsum("bhts,bhsd->bhtd", w, v)
    ctx = ctx.transpose(0, 2, 1, 3).reshape(B, T, E)
    out = lin(ctx, params["wo"], params["bo"])
    return out, w


if __name__ == "__main__":
    B, T, E, H = 2, 8, 32, 4

    key = jax.random.PRNGKey(0)
    keys = jax.random.split(key, 9)
    init = lambda k, shape: (jax.random.normal(k, shape, jnp.float32) * 0.05)

    params = {
        "wq": init(keys[0], (E, E)), "bq": init(keys[1], (E,)),
        "wk": init(keys[2], (E, E)), "bk": init(keys[3], (E,)),
        "wv": init(keys[4], (E, E)), "bv": init(keys[5], (E,)),
        "wo": init(keys[6], (E, E)), "bo": init(keys[7], (E,)),
    }
    hidden_states = jax.random.normal(keys[8], (B, T, E), jnp.float32)

    ref_out, ref_w = _reference(hidden_states, params, num_heads=H)

    # Hot path: output_attentions=False (no O(T^2) HBM writeback).
    out, attn_w = mbart_attention(hidden_states, params, num_heads=H)
    out = jax.block_until_ready(out)
    assert attn_w is None
    np.testing.assert_allclose(np.asarray(out), np.asarray(ref_out),
                               rtol=1e-5, atol=1e-5)

    # Optional path: also return attention weights (output_attentions=True).
    out2, attn_w2 = mbart_attention(hidden_states, params, num_heads=H,
                                    output_attentions=True)
    out2 = jax.block_until_ready(out2)
    attn_w2 = jax.block_until_ready(attn_w2)
    np.testing.assert_allclose(np.asarray(out2), np.asarray(ref_out),
                               rtol=1e-5, atol=1e-5)
    np.testing.assert_allclose(np.asarray(attn_w2), np.asarray(ref_w),
                               rtol=1e-5, atol=1e-5)

    print("KERNEL_OK")
</pallas_src>

<mosaic_0001>
module attributes {stable_mosaic.version = 11 : i64} {
  func.func @_mbart_attn_kernel(%arg0: i32, %arg1: i32, %arg2: memref<1x8x32xf32, #tpu.memory_space<vmem>>, %arg3: memref<1x8x32xf32, #tpu.memory_space<vmem>>, %arg4: memref<32x32xf32, #tpu.memory_space<vmem>>, %arg5: memref<1x32xf32, #tpu.memory_space<vmem>>, %arg6: memref<32x64xf32, #tpu.memory_space<vmem>>, %arg7: memref<1x64xf32, #tpu.memory_space<vmem>>, %arg8: memref<32x32xf32, #tpu.memory_space<vmem>>, %arg9: memref<1x32xf32, #tpu.memory_space<vmem>>, %arg10: memref<1x8x32xf32, #tpu.memory_space<vmem>>, %arg11: memref<8x32xf32, #tpu.memory_space<vmem>>) attributes {dimension_semantics = [#tpu.dimension_semantics<parallel>, #tpu.dimension_semantics<parallel>], iteration_bounds = array<i64: 2, 1>, scalar_prefetch = 0 : i64, scratch_operands = 1 : i64, tpu.core_type = #tpu.core_type<tc>, window_params = [{transform_indices = @transform_0, window_bounds = array<i64: 1, 8, 32>}, {transform_indices = @transform_1, window_bounds = array<i64: 1, 8, 32>}, {pipeline_mode = #tpu.pipeline_mode<synchronous>, transform_indices = @transform_2, window_bounds = array<i64: 32, 32>}, {pipeline_mode = #tpu.pipeline_mode<synchronous>, transform_indices = @transform_3, window_bounds = array<i64: 1, 32>}, {pipeline_mode = #tpu.pipeline_mode<synchronous>, transform_indices = @transform_4, window_bounds = array<i64: 32, 64>}, {pipeline_mode = #tpu.pipeline_mode<synchronous>, transform_indices = @transform_5, window_bounds = array<i64: 1, 64>}, {pipeline_mode = #tpu.pipeline_mode<synchronous>, transform_indices = @transform_6, window_bounds = array<i64: 32, 32>}, {pipeline_mode = #tpu.pipeline_mode<synchronous>, transform_indices = @transform_7, window_bounds = array<i64: 1, 32>}, {transform_indices = @transform_8, window_bounds = array<i64: 1, 8, 32>}]} {
    %c0 = arith.constant 0 : index
    %c0_0 = arith.constant 0 : index
    %c0_1 = arith.constant 0 : index
    %0 = vector.load %arg2[%c0, %c0_0, %c0_1] : memref<1x8x32xf32, #tpu.memory_space<vmem>>, vector<1x8x32xf32>
    %1 = vector.shape_cast %0 : vector<1x8x32xf32> to vector<8x32xf32>
    %c0_2 = arith.constant 0 : index
    %c0_3 = arith.constant 0 : index
    %c0_4 = arith.constant 0 : index
    %2 = vector.load %arg3[%c0_2, %c0_3, %c0_4] : memref<1x8x32xf32, #tpu.memory_space<vmem>>, vector<1x8x32xf32>
    %3 = vector.shape_cast %2 : vector<1x8x32xf32> to vector<8x32xf32>
    %c0_5 = arith.constant 0 : index
    %c0_6 = arith.constant 0 : index
    %4 = vector.load %arg4[%c0_5, %c0_6] : memref<32x32xf32, #tpu.memory_space<vmem>>, vector<32x32xf32>
    %cst = arith.constant dense<0.000000e+00> : vector<8x32xf32>
    %5 = tpu.matmul %3, %4, %cst {dimension_numbers = #tpu.dot_dimension_numbers<[1], [0], [0], [1], [0, 0, 1, 1], [], []>} : vector<8x32xf32>, vector<32x32xf32>, vector<8x32xf32> -> vector<8x32xf32>
    %c0_7 = arith.constant 0 : index
    %c0_8 = arith.constant 0 : index
    %6 = vector.load %arg5[%c0_7, %c0_8] : memref<1x32xf32, #tpu.memory_space<vmem>>, vector<1x32xf32>
    %7 = vector.broadcast %6 : vector<1x32xf32> to vector<8x32xf32>
    %8 = arith.addf %5, %7 : vector<8x32xf32>
    %c0_9 = arith.constant 0 : index
    %c0_10 = arith.constant 0 : index
    %9 = vector.load %arg6[%c0_9, %c0_10] : memref<32x64xf32, #tpu.memory_space<vmem>>, vector<32x64xf32>
    %cst_11 = arith.constant dense<0.000000e+00> : vector<8x64xf32>
    %10 = tpu.matmul %1, %9, %cst_11 {dimension_numbers = #tpu.dot_dimension_numbers<[1], [0], [0], [1], [0, 0, 1, 1], [], []>} : vector<8x32xf32>, vector<32x64xf32>, vector<8x64xf32> -> vector<8x64xf32>
    %c0_12 = arith.constant 0 : index
    %c0_13 = arith.constant 0 : index
    %11 = vector.load %arg7[%c0_12, %c0_13] : memref<1x64xf32, #tpu.memory_space<vmem>>, vector<1x64xf32>
    %12 = vector.broadcast %11 : vector<1x64xf32> to vector<8x64xf32>
    %13 = arith.addf %10, %12 : vector<8x64xf32>
    %14 = vector.extract_strided_slice %8 {offsets = [0, 0], sizes = [8, 8], strides = [1, 1]} : vector<8x32xf32> to vector<8x8xf32>
    %15 = vector.extract_strided_slice %13 {offsets = [0, 0], sizes = [8, 8], strides = [1, 1]} : vector<8x64xf32> to vector<8x8xf32>
    %16 = vector.extract_strided_slice %13 {offsets = [0, 32], sizes = [8, 8], strides = [1, 1]} : vector<8x64xf32> to vector<8x8xf32>
    %cst_14 = arith.constant dense<0.000000e+00> : vector<8x8xf32>
    %17 = tpu.matmul %14, %15, %cst_14 {dimension_numbers = #tpu.dot_dimension_numbers<[1], [1], [0], [0], [0, 0, 1, 0], [], []>} : vector<8x8xf32>, vector<8x8xf32>, vector<8x8xf32> -> vector<8x8xf32>
    %cst_15 = arith.constant dense<0xFF800000> : vector<8xf32>
    %18 = vector.multi_reduction <maximumf>, %17, %cst_15 [1] : vector<8x8xf32> to vector<8xf32>
    %19 = vector.shape_cast %18 : vector<8xf32> to vector<8x1xf32>
    %20 = vector.broadcast %19 : vector<8x1xf32> to vector<8x8xf32>
    %21 = arith.subf %17, %20 : vector<8x8xf32>
    %22 = math.exp %21 : vector<8x8xf32>
    %cst_16 = arith.constant dense<0.000000e+00> : vector<8xf32>
    %23 = vector.multi_reduction <add>, %22, %cst_16 [1] : vector<8x8xf32> to vector<8xf32>
    %24 = vector.shape_cast %23 : vector<8xf32> to vector<8x1xf32>
    %25 = tpu.reciprocal %24 {approx = true} : vector<8x1xf32> -> vector<8x1xf32>
    %26 = arith.mulf %24, %25 : vector<8x1xf32>
    %cst_17 = arith.constant 2.000000e+00 : f32
    %27 = vector.broadcast %cst_17 : f32 to vector<8x1xf32>
    %28 = arith.subf %27, %26 : vector<8x1xf32>
    %29 = arith.mulf %25, %28 : vector<8x1xf32>
    %30 = vector.broadcast %29 : vector<8x1xf32> to vector<8x8xf32>
    %31 = arith.mulf %22, %30 : vector<8x8xf32>
    %cst_18 = arith.constant dense<0.000000e+00> : vector<8x8xf32>
    %32 = tpu.matmul %31, %16, %cst_18 {dimension_numbers = #tpu.dot_dimension_numbers<[1], [0], [0], [1], [0, 0, 1, 1], [], []>} : vector<8x8xf32>, vector<8x8xf32>, vector<8x8xf32> -> vector<8x8xf32>
    %c0_19 = arith.constant 0 : index
    %c0_20 = arith.constant 0 : index
    %33 = vector.load %arg11[%c0_19, %c0_20] : memref<8x32xf32, #tpu.memory_space<vmem>>, vector<8x8xf32>
    tpu.vector_store %arg11[%c0_19, %c0_20], %32 {strides = array<i32>} : memref<8x32xf32, #tpu.memory_space<vmem>>, vector<8x8xf32>,
    %34 = vector.extract_strided_slice %8 {offsets = [0, 8], sizes = [8, 8], strides = [1, 1]} : vector<8x32xf32> to vector<8x8xf32>
    %35 = vector.extract_strided_slice %13 {offsets = [0, 8], sizes = [8, 8], strides = [1, 1]} : vector<8x64xf32> to vector<8x8xf32>
    %36 = vector.extract_strided_slice %13 {offsets = [0, 40], sizes = [8, 8], strides = [1, 1]} : vector<8x64xf32> to vector<8x8xf32>
    %cst_21 = arith.constant dense<0.000000e+00> : vector<8x8xf32>
    %37 = tpu.matmul %34, %35, %cst_21 {dimension_numbers = #tpu.dot_dimension_numbers<[1], [1], [0], [0], [0, 0, 1, 0], [], []>} : vector<8x8xf32>, vector<8x8xf32>, vector<8x8xf32> -> vector<8x8xf32>
    %cst_22 = arith.constant dense<0xFF800000> : vector<8xf32>
    %38 = vector.multi_reduction <maximumf>, %37, %cst_22 [1] : vector<8x8xf32> to vector<8xf32>
    %39 = vector.shape_cast %38 : vector<8xf32> to vector<8x1xf32>
    %40 = vector.broadcast %39 : vector<8x1xf32> to vector<8x8xf32>
    %41 = arith.subf %37, %40 : vector<8x8xf32>
    %42 = math.exp %41 : vector<8x8xf32>
    %cst_23 = arith.constant dense<0.000000e+00> : vector<8xf32>
    %43 = vector.multi_reduction <add>, %42, %cst_23 [1] : vector<8x8xf32> to vector<8xf32>
    %44 = vector.shape_cast %43 : vector<8xf32> to vector<8x1xf32>
    %45 = tpu.reciprocal %44 {approx = true} : vector<8x1xf32> -> vector<8x1xf32>
    %46 = arith.mulf %44, %45 : vector<8x1xf32>
    %cst_24 = arith.constant 2.000000e+00 : f32
    %47 = vector.broadcast %cst_24 : f32 to vector<8x1xf32>
    %48 = arith.subf %47, %46 : vector<8x1xf32>
    %49 = arith.mulf %45, %48 : vector<8x1xf32>
    %50 = vector.broadcast %49 : vector<8x1xf32> to vector<8x8xf32>
    %51 = arith.mulf %42, %50 : vector<8x8xf32>
    %cst_25 = arith.constant dense<0.000000e+00> : vector<8x8xf32>
    %52 = tpu.matmul %51, %36, %cst_25 {dimension_numbers = #tpu.dot_dimension_numbers<[1], [0], [0], [1], [0, 0, 1, 1], [], []>} : vector<8x8xf32>, vector<8x8xf32>, vector<8x8xf32> -> vector<8x8xf32>
    %c0_26 = arith.constant 0 : index
    %c8 = arith.constant 8 : index
    %53 = vector.load %arg11[%c0_26, %c8] : memref<8x32xf32, #tpu.memory_space<vmem>>, vector<8x8xf32>
    tpu.vector_store %arg11[%c0_26, %c8], %52 {strides = array<i32>} : memref<8x32xf32, #tpu.memory_space<vmem>>, vector<8x8xf32>,
    %54 = vector.extract_strided_slice %8 {offsets = [0, 16], sizes = [8, 8], strides = [1, 1]} : vector<8x32xf32> to vector<8x8xf32>
    %55 = vector.extract_strided_slice %13 {offsets = [0, 16], sizes = [8, 8], strides = [1, 1]} : vector<8x64xf32> to vector<8x8xf32>
    %56 = vector.extract_strided_slice %13 {offsets = [0, 48], sizes = [8, 8], strides = [1, 1]} : vector<8x64xf32> to vector<8x8xf32>
    %cst_27 = arith.constant dense<0.000000e+00> : vector<8x8xf32>
    %57 = tpu.matmul %54, %55, %cst_27 {dimension_numbers = #tpu.dot_dimension_numbers<[1], [1], [0], [0], [0, 0, 1, 0], [], []>} : vector<8x8xf32>, vector<8x8xf32>, vector<8x8xf32> -> vector<8x8xf32>
    %cst_28 = arith.constant dense<0xFF800000> : vector<8xf32>
    %58 = vector.multi_reduction <maximumf>, %57, %cst_28 [1] : vector<8x8xf32> to vector<8xf32>
    %59 = vector.shape_cast %58 : vector<8xf32> to vector<8x1xf32>
    %60 = vector.broadcast %59 : vector<8x1xf32> to vector<8x8xf32>
    %61 = arith.subf %57, %60 : vector<8x8xf32>
    %62 = math.exp %61 : vector<8x8xf32>
    %cst_29 = arith.constant dense<0.000000e+00> : vector<8xf32>
    %63 = vector.multi_reduction <add>, %62, %cst_29 [1] : vector<8x8xf32> to vector<8xf32>
    %64 = vector.shape_cast %63 : vector<8xf32> to vector<8x1xf32>
    %65 = tpu.reciprocal %64 {approx = true} : vector<8x1xf32> -> vector<8x1xf32>
    %66 = arith.mulf %64, %65 : vector<8x1xf32>
    %cst_30 = arith.constant 2.000000e+00 : f32
    %67 = vector.broadcast %cst_30 : f32 to vector<8x1xf32>
    %68 = arith.subf %67, %66 : vector<8x1xf32>
    %69 = arith.mulf %65, %68 : vector<8x1xf32>
    %70 = vector.broadcast %69 : vector<8x1xf32> to vector<8x8xf32>
    %71 = arith.mulf %62, %70 : vector<8x8xf32>
    %cst_31 = arith.constant dense<0.000000e+00> : vector<8x8xf32>
    %72 = tpu.matmul %71, %56, %cst_31 {dimension_numbers = #tpu.dot_dimension_numbers<[1], [0], [0], [1], [0, 0, 1, 1], [], []>} : vector<8x8xf32>, vector<8x8xf32>, vector<8x8xf32> -> vector<8x8xf32>
    %c0_32 = arith.constant 0 : index
    %c16 = arith.constant 16 : index
    %73 = vector.load %arg11[%c0_32, %c16] : memref<8x32xf32, #tpu.memory_space<vmem>>, vector<8x8xf32>
    tpu.vector_store %arg11[%c0_32, %c16], %72 {strides = array<i32>} : memref<8x32xf32, #tpu.memory_space<vmem>>, vector<8x8xf32>,
    %74 = vector.extract_strided_slice %8 {offsets = [0, 24], sizes = [8, 8], strides = [1, 1]} : vector<8x32xf32> to vector<8x8xf32>
    %75 = vector.extract_strided_slice %13 {offsets = [0, 24], sizes = [8, 8], strides = [1, 1]} : vector<8x64xf32> to vector<8x8xf32>
    %76 = vector.extract_strided_slice %13 {offsets = [0, 56], sizes = [8, 8], strides = [1, 1]} : vector<8x64xf32> to vector<8x8xf32>
    %cst_33 = arith.constant dense<0.000000e+00> : vector<8x8xf32>
    %77 = tpu.matmul %74, %75, %cst_33 {dimension_numbers = #tpu.dot_dimension_numbers<[1], [1], [0], [0], [0, 0, 1, 0], [], []>} : vector<8x8xf32>, vector<8x8xf32>, vector<8x8xf32> -> vector<8x8xf32>
    %cst_34 = arith.constant dense<0xFF800000> : vector<8xf32>
    %78 = vector.multi_reduction <maximumf>, %77, %cst_34 [1] : vector<8x8xf32> to vector<8xf32>
    %79 = vector.shape_cast %78 : vector<8xf32> to vector<8x1xf32>
    %80 = vector.broadcast %79 : vector<8x1xf32> to vector<8x8xf32>
    %81 = arith.subf %77, %80 : vector<8x8xf32>
    %82 = math.exp %81 : vector<8x8xf32>
    %cst_35 = arith.constant dense<0.000000e+00> : vector<8xf32>
    %83 = vector.multi_reduction <add>, %82, %cst_35 [1] : vector<8x8xf32> to vector<8xf32>
    %84 = vector.shape_cast %83 : vector<8xf32> to vector<8x1xf32>
    %85 = tpu.reciprocal %84 {approx = true} : vector<8x1xf32> -> vector<8x1xf32>
    %86 = arith.mulf %84, %85 : vector<8x1xf32>
    %cst_36 = arith.constant 2.000000e+00 : f32
    %87 = vector.broadcast %cst_36 : f32 to vector<8x1xf32>
    %88 = arith.subf %87, %86 : vector<8x1xf32>
    %89 = arith.mulf %85, %88 : vector<8x1xf32>
    %90 = vector.broadcast %89 : vector<8x1xf32> to vector<8x8xf32>
    %91 = arith.mulf %82, %90 : vector<8x8xf32>
    %cst_37 = arith.constant dense<0.000000e+00> : vector<8x8xf32>
    %92 = tpu.matmul %91, %76, %cst_37 {dimension_numbers = #tpu.dot_dimension_numbers<[1], [0], [0], [1], [0, 0, 1, 1], [], []>} : vector<8x8xf32>, vector<8x8xf32>, vector<8x8xf32> -> vector<8x8xf32>
    %c0_38 = arith.constant 0 : index
    %c24 = arith.constant 24 : index
    %93 = vector.load %arg11[%c0_38, %c24] : memref<8x32xf32, #tpu.memory_space<vmem>>, vector<8x8xf32>
    tpu.vector_store %arg11[%c0_38, %c24], %92 {strides = array<i32>} : memref<8x32xf32, #tpu.memory_space<vmem>>, vector<8x8xf32>,
    %c0_39 = arith.constant 0 : index
    %c0_40 = arith.constant 0 : index
    %94 = vector.load %arg11[%c0_39, %c0_40] : memref<8x32xf32, #tpu.memory_space<vmem>>, vector<8x32xf32>
    %c0_41 = arith.constant 0 : index
    %c0_42 = arith.constant 0 : index
    %95 = vector.load %arg8[%c0_41, %c0_42] : memref<32x32xf32, #tpu.memory_space<vmem>>, vector<32x32xf32>
    %cst_43 = arith.constant dense<0.000000e+00> : vector<8x32xf32>
    %96 = tpu.matmul %94, %95, %cst_43 {dimension_numbers = #tpu.dot_dimension_numbers<[1], [0], [0], [1], [0, 0, 1, 1], [], []>} : vector<8x32xf32>, vector<32x32xf32>, vector<8x32xf32> -> vector<8x32xf32>
    %c0_44 = arith.constant 0 : index
    %c0_45 = arith.constant 0 : index
    %97 = vector.load %arg9[%c0_44, %c0_45] : memref<1x32xf32, #tpu.memory_space<vmem>>, vector<1x32xf32>
    %98 = vector.broadcast %97 : vector<1x32xf32> to vector<8x32xf32>
    %99 = arith.addf %96, %98 : vector<8x32xf32>
    %c0_46 = arith.constant 0 : index
    %c0_47 = arith.constant 0 : index
    %c0_48 = arith.constant 0 : index
    %100 = vector.load %arg10[%c0_46, %c0_47, %c0_48] : memref<1x8x32xf32, #tpu.memory_space<vmem>>, vector<1x8x32xf32>
    %101 = vector.shape_cast %100 : vector<1x8x32xf32> to vector<8x32xf32>
    %102 = vector.shape_cast %99 : vector<8x32xf32> to vector<1x8x32xf32>
    tpu.vector_store %arg10[%c0_46, %c0_47, %c0_48], %102 {strides = array<i32>} : memref<1x8x32xf32, #tpu.memory_space<vmem>>, vector<1x8x32xf32>,
    return
  }
  func.func @transform_0(%arg0: i32, %arg1: i32) -> (i32, i32, i32) {
    %c0_i32 = arith.constant 0 : i32
    %c0_i32_0 = arith.constant 0 : i32
    %c0_i32_1 = arith.constant 0 : i32
    return %arg0, %c0_i32, %c0_i32_0 : i32, i32, i32
  }
  func.func @transform_1(%arg0: i32, %arg1: i32) -> (i32, i32, i32) {
    %c0_i32 = arith.constant 0 : i32
    %c0_i32_0 = arith.constant 0 : i32
    return %arg0, %arg1, %c0_i32 : i32, i32, i32
  }
  func.func @transform_2(%arg0: i32, %arg1: i32) -> (i32, i32) {
    %c0_i32 = arith.constant 0 : i32
    %c0_i32_0 = arith.constant 0 : i32
    %c0_i32_1 = arith.constant 0 : i32
    return %c0_i32, %c0_i32_0 : i32, i32
  }
  func.func @transform_3(%arg0: i32, %arg1: i32) -> (i32, i32) {
    %c0_i32 = arith.constant 0 : i32
    %c0_i32_0 = arith.constant 0 : i32
    %c0_i32_1 = arith.constant 0 : i32
    return %c0_i32, %c0_i32_0 : i32, i32
  }
  func.func @transform_4(%arg0: i32, %arg1: i32) -> (i32, i32) {
    %c0_i32 = arith.constant 0 : i32
    %c0_i32_0 = arith.constant 0 : i32
    %c0_i32_1 = arith.constant 0 : i32
    return %c0_i32, %c0_i32_0 : i32, i32
  }
  func.func @transform_5(%arg0: i32, %arg1: i32) -> (i32, i32) {
    %c0_i32 = arith.constant 0 : i32
    %c0_i32_0 = arith.constant 0 : i32
    %c0_i32_1 = arith.constant 0 : i32
    return %c0_i32, %c0_i32_0 : i32, i32
  }
  func.func @transform_6(%arg0: i32, %arg1: i32) -> (i32, i32) {
    %c0_i32 = arith.constant 0 : i32
    %c0_i32_0 = arith.constant 0 : i32
    %c0_i32_1 = arith.constant 0 : i32
    return %c0_i32, %c0_i32_0 : i32, i32
  }
  func.func @transform_7(%arg0: i32, %arg1: i32) -> (i32, i32) {
    %c0_i32 = arith.constant 0 : i32
    %c0_i32_0 = arith.constant 0 : i32
    %c0_i32_1 = arith.constant 0 : i32
    return %c0_i32, %c0_i32_0 : i32, i32
  }
  func.func @transform_8(%arg0: i32, %arg1: i32) -> (i32, i32, i32) {
    %c0_i32 = arith.constant 0 : i32
    %c0_i32_0 = arith.constant 0 : i32
    return %arg0, %arg1, %c0_i32 : i32, i32, i32
  }
}

</mosaic_0001>

<bundles_post_ra>
// kernel: tpu_custom_call.1
= control target key start
LH: loop header
LB: loop body
LE: loop exit
PB: predicated region body
PF: predicated region fallthrough
CT: control target
= control target key end

     0   :  { %s2379_s0 = inlined_call_operand.hbm [shape: f32[2,8,32], index: 0, kind: input, shape index: {}]   ;;  %s2380_s1 = inlined_call_operand.hbm [shape: f32[2,8,32], index: 1, kind: input, shape index: {}]   ;;  %s2381_s2 = inlined_call_operand.hbm [shape: f32[32,32], index: 2, kind: input, shape index: {}]   ;;  %s2382_s3 = inlined_call_operand.vmem [shape: f32[1,32], index: 3, kind: input, shape index: {}]   ;;  %s2383_s4 = inlined_call_operand.hbm [shape: f32[32,64], index: 4, kind: input, shape index: {}]   ;;  %s2384_s5 = inlined_call_operand.vmem [shape: f32[1,64], index: 5, kind: input, shape index: {}]   ;;  %s2385_s6 = inlined_call_operand.hbm [shape: f32[32,32], index: 6, kind: input, shape index: {}]   ;;  %s2386_s7 = inlined_call_operand.vmem [shape: f32[1,32], index: 7, kind: input, shape index: {}]   ;;  %s2387_s8 = inlined_call_operand.hbm [shape: f32[2,8,32], index: 8, kind: output, shape index: {}]  }
   0x1   :  { %2392 = sst [smem:[#allocation20_spill]] %s2379_s0 }
   0x2   :  { %2393 = sst [smem:[#allocation21_spill]] %s2381_s2 }
   0x3   :  { %2394 = sst [smem:[#allocation22_spill]] %s2383_s4 }
   0x4   :  { %2395 = sst [smem:[#allocation23_spill]] %s2385_s6 }
   0x5   :  { %13 = vsyncpa [#allocation4], 0 }
   0x6   :  { %15 = vsyncpa [#allocation4 + $0x1], 0 }
   0x7   :  { %16 = vsyncpa [#allocation7], 0 }
   0x8   :  { %18 = vsyncpa [#allocation7 + $0x1], 0 }
   0x9   :  { %19 = vsyncpa [#allocation10], 0 }
   0xa   :  { %20 = vsyncpa [#allocation5], 0 }
   0xb   :  { %22 = vsyncpa [#allocation5 + $0x1], 0  ;;  %s2076_s27 = smov 0   ;;  %s2078_s28 = smov 0  }
   0xc   :  { %s2080_s29 = smov 0   ;;  %s2082_s30 = smov 0  }
   0xd   :  { %s2084_s9 = smov 0   ;;  %s2086_s10 = smov 0  }
   0xe LB: > { %s2107_s11 = sadd.s32 4294967295, %s2009_s10   ;;  %s1512_s12 = sadd.s32 4294967294, %s2009_s10   ;;  %s2009_s10 = sphi %s2086_s10, %s28_s10   ;;  %s2005_s9 = sphi %s2084_s9, %s2422_s9   ;;  %s2001_s30 = sphi %s2082_s30, %s2421_s30   ;;  %s1997_s29 = sphi %s2080_s29, %s2420_s29   ;;  %s1993_s28 = sphi %s2078_s28, %s2419_s28   ;;  %s1989_s27 = sphi %s2076_s27, %s2418_s27  }
   0xf   : > { %p60_p0 = scmp.ne.s32.totalorder %s1993_s28, %s1989_s27  ;;  %p2388_p1 = scmp.eq.s32.totalorder %s2107_s11, 0 }
  0x10   : > { %p246_p3 = scmp.eq.s32.totalorder %s1512_s12, 1  ;;  %p1513_p5 = scmp.ge.s32.totalorder %s2009_s10, 1 }
  0x11   : > { %p2116_p4 = por %p2388_p1, %p60_p0  ;;  %p253_p7 = scmp.lt.s32.totalorder %s2009_s10, 3 }
  0x12   : > { %p2121_p6 = por %p246_p3, %p60_p0  ;;  %s2011_s16 = smov [#allocation8]  }
  0x13   : > { %s2396_s13 = scalar_select %p2116_p4, 1, 0 }
  0x14   : > { %s2397_s14 = scalar_select %p2121_p6, 1, 0 }
  0x15   : > { %p2126_p8 = pnand %p1513_p5, %p253_p7  ;;  %s265_s17 = sshll.u32 %s2011_s16, 4  ;;  %s266_s17 = int_to_ptr.vmem [resolvable:$true] %s265_s17 }
  0x16   : > { %2398 = sst [smem:[#allocation18_spill]] %s2397_s14  ;;  %s2012_s19 = smov [#allocation9]  }
  0x17   : > { %p1673_p9 = pneg %p2126_p8  ;;  %s281_s20 = sshll.u32 %s2012_s19, 4  ;;  %s282_s20 = int_to_ptr.vmem [resolvable:$true] %s281_s20 }
  0x18   : > { %s2013_s21 = smov [#allocation11]   ;;  %s1794_s23 = scalar_lea.vmem %s266_s17, 512 }
  0x19   : > { %p2135_p11 = pnand %p1673_p9, %p2388_p1  ;;  %s297_s22 = sshll.u32 %s2013_s21, 4  ;;  %s298_s22 = int_to_ptr.vmem [resolvable:$true] %s297_s22 }
  0x1a   : > { %p1795_p13 = scmp.ne.s32.totalorder %s266_s17, %s1794_s23  ;;  %p1802_p5 = scmp.lt.s32.totalorder %s266_s17, %s266_s17 }
  0x1b   : > { %p1785_p12 = pneg %p2135_p11  ;;  %p1803_p7 = scmp.lt.s32.totalorder %s1794_s23, %s1794_s23 }
  0x1d   : > { %p1797_p0 = pnand %p1795_p13, %p1785_p12  ;;  %p1804_p9 = por %p1803_p7, %p1802_p5 }
  0x1f   : > { %p1798_p3 = pneg %p1797_p0 }
  0x21   : > { %p1805_p10 = pnand %p1804_p9, %p1798_p3 }
  0x23   : > { %1808 = shalt.err (!%p1805_p10)
}
  0x24   : > { %s2014_s24 = smov 128   ;;  %s2015_s25 = smov 8  }
  0x25   : > { %s2401_s2 = sld [smem:[#allocation21_spill]]  ;;  %s1820_s16 = scalar_lea.vmem %s282_s20, 512 }
  0x26   : > { %p1821_p1 = scmp.ne.s32.totalorder %s282_s20, %s1820_s16  ;;  %p1828_p2 = scmp.lt.s32.totalorder %s282_s20, %s282_s20 }
  0x27   : > { %p1829_p6 = scmp.lt.s32.totalorder %s1820_s16, %s1820_s16 }
  0x28   : > { %p1823_p13 = pnand %p1821_p1, %p1785_p12 }
  0x29   : > { %p1830_p5 = por %p1829_p6, %p1828_p2 }
  0x2a   : > { %p1824_p0 = pneg %p1823_p13 }
  0x2b   : > { %1676 = dma.hbm_to_vmem [thread:$0]  (!%p2135_p11), %s2401_s2, 512, %s266_s17, [#allocation7], %s2014_s24, %s2014_s24, %s2015_s25  }
  0x2c   : > { %p1831_p3 = pnand %p1830_p5, %p1824_p0 }
  0x2e   : > { %1834 = shalt.err (!%p1831_p3)
}
  0x2f   : > { %s2402_s4 = sld [smem:[#allocation22_spill]]  ;;  %s1846_s17 = scalar_lea.vmem %s298_s22, 512 }
  0x30   : > { %p1847_p10 = scmp.ne.s32.totalorder %s298_s22, %s1846_s17  ;;  %p1854_p9 = scmp.lt.s32.totalorder %s298_s22, %s298_s22 }
  0x31   : > { %p1855_p13 = scmp.lt.s32.totalorder %s1846_s17, %s1846_s17 }
  0x32   : > { %p1849_p7 = pnand %p1847_p10, %p1785_p12 }
  0x33   : > { %p1856_p4 = por %p1855_p13, %p1854_p9 }
  0x34   : > { %p1850_p1 = pneg %p1849_p7 }
  0x35   : > { %1679 = dma.hbm_to_vmem [thread:$0]  (!%p2135_p11), %s2402_s4, 512, %s282_s20, [#allocation10], %s2014_s24, %s2014_s24, %s2015_s25  }
  0x36   : > { %p1857_p2 = pnand %p1856_p4, %p1850_p1 }
  0x38   : > { %1860 = shalt.err (!%p1857_p2)
}
  0x39   : > { %s2403_s6 = sld [smem:[#allocation23_spill]]  ;;  %s47_s20 = sadd.s32 1, %s1997_s29 }
  0x3a   : > { %s40_s12 = sadd.s32 1, %s2005_s9  ;;  %p54_p4 = scmp.ne.s32.totalorder %s1997_s29, %s1993_s28 }
  0x3b   : > { %p42_p6 = scmp.ge.s32.totalorder %s40_s12, 2  ;;  %p55_p12 = scmp.eq.s32.totalorder %s2009_s10, 0 }
  0x3c   : > { %p2404_p0 = scmp.eq.s32.totalorder %s2107_s11, 1  ;;  %p1697_p3 = scmp.lt.s32.totalorder %s2009_s10, 2 }
  0x3d   : > { %s2424_s12 = smov (%p42_p6, %s40_s12), 0  ;;  %p56_p10 = por %p55_p12, %p54_p4 }
  0x3e   : > { %p2172_p5 = por %p2404_p0, %p54_p4  ;;  %2406 = sst [smem:[#allocation19_spill]] %s2424_s12 }
  0x3f   : > { %1682 = dma.hbm_to_vmem [thread:$0]  (!%p2135_p11), %s2403_s6, 512, %s298_s22, [#allocation10], %s2014_s24, %s2014_s24, %s2015_s25  }
  0x40   : > { %s314_s16 = sand.u32 1, %s1997_s29   ;;  %s44_s19 = ssub.s32 %s2005_s9, %s2424_s12 }
  0x41   : > { %p45_p11 = scmp.eq.s32.totalorder %s44_s19, 0  ;;  %s1518_s22 = sshll.u32 %s314_s16, 3 }
  0x42   : > { %s1519_s24 = sshll.u32 %s2005_s9, 7  ;;  %s2407_s0 = sld [smem:[#allocation20_spill]] }
  0x43   : > { %s2184_s25 = scalar_select %p45_p11, %s1997_s29, %s47_s20  }
  0x44   : > { %s318_s26 = scalar_lea.vmem [#allocation3], %s1518_s22  ;;  %p2191_p7 = pnand %p1697_p3, %p56_p10 }
  0x45   : > { %s325_s2 = sshll.u32 %s318_s26, 4  ;;  %s2198_s19 = scalar_lea.hbm %s2380_s1, %s1519_s24  ;;  %s326_s2 = int_to_ptr.vmem [resolvable:$true] %s325_s2 }
  0x46   : > { %s332_s20 = sand.u32 1, %s2009_s10   ;;  %s315_s12 = scalar_lea.sflag [#allocation4], %s314_s16 }
  0x47   : > { %p1863_p1 = pneg %p2191_p7  ;;  %s1874_s21 = scalar_lea.vmem %s326_s2, 128 }
  0x48   : > { %s323_s23 = scalar_lea.hbm %s2407_s0, %s1519_s24  ;;  %p1875_p9 = scmp.ne.s32.totalorder %s326_s2, %s1874_s21 }
  0x49   : > { %s2016_s17 = smov [#allocation3]  }
  0x4a   : > { %p1877_p13 = pnand %p1875_p9, %p1863_p1  ;;  %s1879_s26 = sshll.u32 %s2016_s17, 4  ;;  %s1880_s26 = int_to_ptr.vmem [resolvable:$false] %s1879_s26 }
  0x4b   : > { %s1881_s0 = scalar_lea.vmem %s1880_s26, 256  ;;  %p1882_p4 = scmp.lt.s32.totalorder %s326_s2, %s1880_s26 }
  0x4c   : > { %p1878_p2 = pneg %p1877_p13  ;;  %p1883_p6 = scmp.lt.s32.totalorder %s1881_s0, %s1874_s21 }
  0x4e   : > { %p1884_p12 = por %p1883_p6, %p1882_p4 }
  0x50   : > { %p1885_p0 = pnand %p1884_p12, %p1878_p2 }
  0x52   : > { %1888 = shalt.err (!%p1885_p0)
}
  0x53   : > { %1686 = dma.hbm_to_vmem [thread:$0]  (!%p2191_p7), %s323_s23, 128, %s326_s2, %s315_s12  }
  0x54   : > { %s336_s6 = scalar_lea.vmem [#allocation6], %s1518_s22  ;;  %s333_s16 = scalar_lea.sflag [#allocation7], %s332_s20 }
  0x55   : > { %s344_s14 = sshll.u32 %s336_s6, 4  ;;  %s2017_s17 = smov [#allocation6]   ;;  %s345_s14 = int_to_ptr.vmem [resolvable:$true] %s344_s14 }
  0x56   : > { %s1902_s24 = scalar_lea.vmem %s345_s14, 128  ;;  %s1907_s26 = sshll.u32 %s2017_s17, 4  ;;  %s1908_s26 = int_to_ptr.vmem [resolvable:$false] %s1907_s26 }
  0x57   : > { %p1903_p3 = scmp.ne.s32.totalorder %s345_s14, %s1902_s24  ;;  %s1909_s0 = scalar_lea.vmem %s1908_s26, 256 }
  0x58   : > { %p1910_p9 = scmp.lt.s32.totalorder %s345_s14, %s1908_s26  ;;  %p1911_p13 = scmp.lt.s32.totalorder %s1909_s0, %s1902_s24 }
  0x59   : > { %p1905_p10 = pnand %p1903_p3, %p1863_p1 }
  0x5a   : > { %p1912_p2 = por %p1911_p13, %p1910_p9 }
  0x5b   : > { %p1906_p11 = pneg %p1905_p10 }
  0x5d   : > { %p1913_p4 = pnand %p1912_p2, %p1906_p11 }
  0x5f   : > { %1916 = shalt.err (!%p1913_p4)
}
  0x60   : > { %1689 = dma.hbm_to_vmem [thread:$0]  (!%p2191_p7), %s2198_s19, 128, %s345_s14, %s333_s16  }
  0x61   : > { %353 = sbr.rel (%p2126_p8) target bundleno = 1481 (0x5c9), region = 52  ;;  %s2217_s2 = sand.u32 (!%p2126_p8), 1, %s1993_s28  }
  0x62   : > { %s2220_s12 = sshll.u32 (!%p2126_p8), %s2217_s2, 3  ;;  %s356_s22 = scalar_lea.sflag (!%p2126_p8), [#allocation4], %s2217_s2 }
  0x63   : > { %s359_s23 = scalar_lea.vmem (!%p2126_p8), [#allocation3], %s2220_s12  ;;  %p2409_p1 = scmp.ne.s32.totalorder (!%p2126_p8), %s2396_s13, 0 }
  0x66   : > { %1968 = dma.done.wait (%p2409_p1), %s356_s22, 128  }
  0x67   : > { %1970 = vsyncadd (%p2409_p1), %s356_s22, 4294967168  ;;  %s364_s4 = sand.u32 1, %s2107_s11   ;;  %s368_s19 = scalar_lea.vmem [#allocation6], %s2220_s12 }
  0x68   : > { %s365_s15 = scalar_lea.sflag [#allocation7], %s364_s4 }
  0x69   : > { %1972 = dma.done.wait (%p2409_p1), %s365_s15, 128  }
  0x6a   : > { %1974 = vsyncadd (%p2409_p1), %s365_s15, 4294967168  ;;  %p2410_p8 = scmp.eq.s32.totalorder %s2107_s11, 0 }
  0x6c   : > { %1976 = dma.done.wait (%p2410_p8), [#allocation7], 512   ;;  %p2411_p7 = pmov %p2410_p8 }
  0x6e   : > { %1978 = vsyncadd (%p2411_p7), [#allocation7], 4294966784  ;;  %p2412_p6 = pmov %p2411_p7 }
  0x70   : > { %1980 = dma.done.wait (%p2412_p6), [#allocation10], 1024   ;;  %p2413_p12 = pmov %p2412_p6 }
  0x71   : > { %v2018_v0 = vmov 0.0   ;;  %vm2019_vm0 = vmmov 0   ;;  %v508_v1 = vld [vmem:[#allocation9 + $0x18] sm:$0xff]  ;;  %v507_v3 = vld [vmem:[#allocation9 + $0x10] sm:$0xff]  ;;  %v506_v5 = vld [vmem:[#allocation9 + $0x8] sm:$0xff]  ;;  %vm431_vm1 = vcmask 261120  }
  0x72   : > { %1982 = vsyncadd (%p2413_p12), [#allocation10], 4294966272  ;;  %1593 = vmatprep.subr.mxu1 %v2018_v0  ;;  %1582 = vmatprep.subr.mxu0 %v2018_v0  ;;  %v423_v2 = vld [vmem:[#allocation8 + $0x18] sm:$0xff]  ;;  %v422_v4 = vld [vmem:[#allocation8 + $0x10] sm:$0xff]  ;;  %vm589_vm2 = vcmask 64512   ;;  %s2020_s6 = smov 112  }
  0x73   : > { %1601 = vmatprep.mubr.msk.f32.mxu1 %vm2019_vm0, %v2018_v0  ;;  %1590 = vmatprep.mubr.msk.f32.mxu0 %vm2019_vm0, %v2018_v0  ;;  %v421_v6 = vld [vmem:[#allocation8 + $0x8] sm:$0xff]  ;;  %v505_v7 = vld [vmem:[#allocation9] sm:$0xff]  ;;  %v419_v10 = vld [vmem:[%s368_s19] sm:$0xff]  ;;  %s2021_s14 = smov 120   ;;  %s2022_s16 = smov 104   ;;  %vm929_vm3 = vcmask 130112  }
  0x74   : > { %1594 = vmatpush3.msra.mxu1 %v508_v1  ;;  %1583 = vmatpush3.msra.mxu0 %v423_v2  ;;  %v420_v8 = vld [vmem:[#allocation8] sm:$0xff]  ;;  %v1531_v11 = vld [vmem:[%s2384_s5] ss:$0 sm:$0xff]  ;;  %s2023_s24 = smov 96   ;;  %s2024_s17 = smov 80   ;;  %vm1103_vm4 = vcmask 195712  }
  0x75   : > { %1595 = vmatprep.subr.mxu1 %v2018_v0  ;;  %1584 = vmatprep.subr.mxu0 %v2018_v0  ;;  %v418_v9 = vld [vmem:[%s359_s23] sm:$0xff]  ;;  %v1529_v13 = vld [vmem:[%s2382_s3] ss:$0 sm:$0xff]  ;;  %s2025_s26 = smov 72   ;;  %s2026_s0 = smov 88   ;;  %vm1277_vm5 = vcmask 261312  }
  0x76   : > { %1596 = vmatpush3.msra.mxu1 %v507_v3  ;;  %1585 = vmatpush3.msra.mxu0 %v422_v4  ;;  %s2027_s22 = smov 8   ;;  %s2028_s23 = smov 16  }
  0x77   : > { %1597 = vmatprep.subr.mxu1 %v2018_v0  ;;  %1586 = vmatprep.subr.mxu0 %v2018_v0  ;;  %s2029_s4 = smov 24   ;;  %s1548_s11 = sshll.u32 %s2001_s30, 7 }
  0x78   : > { %1598 = vmatpush3.msra.mxu1 %v506_v5  ;;  %1587 = vmatpush3.msra.mxu0 %v421_v6  ;;  %s417_s13 = scalar_lea.vmem [#allocation12], %s2220_s12  ;;  %s2030_s30 = smov [#allocation12]  }
  0x79   : > { %1599 = vmatprep.subr.mxu1 %v2018_v0  ;;  %1588 = vmatprep.subr.mxu0 %v2018_v0  ;;  %s1380_s20 = sshll.u32 %s417_s13, 4  ;;  %s1921_s12 = sshll.u32 %s2030_s30, 4  ;;  %s1381_s20 = int_to_ptr.vmem [resolvable:$true] %s1380_s20  ;;  %s1922_s12 = int_to_ptr.vmem [resolvable:$false] %s1921_s12 }
  0x7a   : > { %1600 = vmatpush3.msra.mxu1 %v505_v7  ;;  %1589 = vmatpush3.msra.mxu0 %v420_v8  ;;  %p1924_p11 = scmp.lt.s32.totalorder %s1381_s20, %s1922_s12 }
  0x7b   : > { %1602 = vmatmul.mubr.msk.f32.vlgmr.msra.gmra.mxu1 %vm431_vm1, %v418_v9  ;;  %1591 = vmatmul.mubr.msk.f32.vlgmr.msra.gmra.mxu0 %vm431_vm1, %v419_v10 }
  0x7c   : > { %1604 = vmatprep.subr.mxu1 %v2018_v0  ;;  %1606 = vmatprep.mubr.msk.f32.mxu1 %vm2019_vm0, %v2018_v0 }
  0x7d   : > { %1614 = vmatprep.subr.mxu0 %v2018_v0  ;;  %1616 = vmatprep.mubr.msk.f32.mxu0 %vm2019_vm0, %v2018_v0 }
 0x13b   : > { %v585_v12 = vpop.f32.mrf.mxu1  ;;  %v501_v14 = vpop.f32.mrf.mxu0 }
 0x13c   : > { %v2272_v15 = vadd.f32 %v1531_v11, %v585_v12  ;;  %v502_v18 = vadd.f32 %v1529_v13, %v501_v14 }
 0x13d   : > { %v1603_v16 = vpop.f32.mrf.mxu1  ;;  %v1592_v17 = vpop.f32.mrf.mxu0 }
 0x13e   : > { %933 = vrot.lane.b32.xlu1 %v2272_v15, %s2020_s6  ;;  %759 = vrot.lane.b32.xlu0 %v2272_v15, %s2021_s14 }
 0x13f   : > { %1605 = vmatpush3.xpose.msk.msra.mxu1 %vm589_vm2, %v2272_v15 }
 0x140   : > { %1609 = vmatprep.subr.mxu1 %v2018_v0 }
 0x142   : > { %1607 = vmatmul.mubr.msk.f32.vlgmr.msra.gmra.mxu1 %vm589_vm2, %v502_v18  ;;  %931 = vrot.lane.b32.xlu1 %v502_v18, %s2020_s6 }
 0x143   : > { %757 = vrot.lane.b32.xlu0 %v502_v18, %s2021_s14  ;;  %1611 = vmatprep.mubr.msk.f32.mxu1 %vm2019_vm0, %v2018_v0  ;;  %s2336_s14 = scalar_lea.hbm %s2387_s8, %s1548_s11 }
 0x146   : > { %1105 = vrot.lane.b32.xlu1 %v502_v18, %s2022_s16 }
 0x147   : > { %1107 = vrot.lane.b32.xlu0 %v2272_v15, %s2022_s16  ;;  %s1366_s16 = scalar_lea.sflag [#allocation5], %s2217_s2 }
 0x1b0   : > { %v760_v19 = vpop.permute.xlu0 %759  ;;  %v934_v20 = vpop.permute.xlu1 %933 }
 0x1b1   : > { %1615 = vmatpush3.xpose.msk.msra.mxu0 %vm589_vm2, %v760_v19 }
 0x1b2   : > { %1624 = vmatprep.subr.mxu0 %v2018_v0 }
 0x1b4   : > { %v932_v22 = vpop.permute.xlu1 %931 }
 0x1b5   : > { %v758_v21 = vpop.permute.xlu0 %757 }
 0x1b6   : > { %1617 = vmatmul.mubr.msk.f32.vlgmr.msra.gmra.mxu0 %vm589_vm2, %v758_v21 }
 0x1b7   : > { %1625 = vmatpush3.xpose.msk.msra.mxu0 %vm589_vm2, %v934_v20  ;;  %1626 = vmatprep.mubr.msk.f32.mxu0 %vm2019_vm0, %v2018_v0 }
 0x1b8   : > { %1634 = vmatprep.subr.mxu0 %v2018_v0  ;;  %v1106_v24 = vpop.permute.xlu1 %1105 }
 0x1b9   : > { %v1108_v23 = vpop.permute.xlu0 %1107 }
 0x1ba   : > { %1627 = vmatmul.mubr.msk.f32.vlgmr.msra.gmra.mxu0 %vm589_vm2, %v932_v22 }
 0x1bb   : > { %1635 = vmatpush3.xpose.msk.msra.mxu0 %vm589_vm2, %v1108_v23  ;;  %1636 = vmatprep.mubr.msk.f32.mxu0 %vm2019_vm0, %v2018_v0 }
 0x1bc   : > { %1644 = vmatprep.subr.mxu0 %v2018_v0 }
 0x1be   : > { %1637 = vmatmul.mubr.msk.f32.vlgmr.msra.gmra.mxu0 %vm589_vm2, %v1106_v24  ;;  %v1283_v24 = vld [vmem:[#allocation11 + $0x18] sm:$0xff] }
 0x1bf   : > { %1652 = vmatprep.mubr.msk.f32.mxu0 %vm2019_vm0, %v2018_v0  ;;  %1645 = vmatpush3.msra.mxu0 %v1283_v24 }
 0x1c0   : > { %1646 = vmatprep.subr.mxu0 %v2018_v0 }
 0x202   : > { %v662_v25 = vpop.f32.mrf.mxu1 }
 0x203   : > { %v666_v26 = vsel %vm589_vm2, %v662_v25, -inf }
 0x204   : > { %667 = vmax.xlane.f32.xlu0 %v666_v26  ;;  %v1608_v27 = vpop.f32.mrf.mxu1  ;;  %v1281_v26 = vld [vmem:[#allocation11 + $0x8] sm:$0xff] }
 0x276   : > { %v831_v28 = vpop.f32.mrf.mxu0 }
 0x277   : > { %v835_v29 = vsel %vm589_vm2, %v831_v28, -inf }
 0x278   : > { %836 = vmax.xlane.f32.xlu1 %v835_v29  ;;  %v1618_v30 = vpop.f32.mrf.mxu0 }
 0x27a   : > { %v1005_v31 = vpop.f32.mrf.mxu0 }
 0x27b   : > { %v1009_v32 = vsel %vm589_vm2, %v1005_v31, -inf }
 0x27c   : > { %v1628_v33 = vpop.f32.mrf.mxu0  ;;  %1010 = vmax.xlane.f32.xlu0 %v1009_v32 }
 0x27e   : > { %v1179_v34 = vpop.f32.mrf.mxu0 }
 0x27f   : > { %v1183_v35 = vsel %vm589_vm2, %v1179_v34, -inf }
 0x280   : > { %v1638_v36 = vpop.f32.mrf.mxu0  ;;  %1184 = vmax.xlane.f32.xlu0 %v1183_v35 }
 0x28d   : > { %v668_v37 = vpop.xlane.xlu0 %667 }
 0x28e   : > { %v669_v38 = vsub.f32 %v662_v25, %v668_v37  ;;  %v1282_v25 = vld [vmem:[#allocation11 + $0x10] sm:$0xff]  ;;  %v1545_v37 = vld [vmem:[%s2386_s7] ss:$0 sm:$0xff] }
 0x28f   : > { %1647 = vmatpush3.msra.mxu0 %v1282_v25 }
 0x290   : > { %v670_v39 = vmul.f32 1.442695, %v669_v38  ;;  %1648 = vmatprep.subr.mxu0 %v2018_v0 }
 0x291   : > { %1649 = vmatpush3.msra.mxu0 %v1281_v26 }
 0x292   : > { %1767 = vpow2.f32 %v670_v39  ;;  %1650 = vmatprep.subr.mxu0 %v2018_v0 }
 0x29f   : > { %v1768_v40 = vpop.eup %1767 }
 0x2a0   : > { %v672_v41 = vsel %vm589_vm2, %v1768_v40, 0.0 }
 0x2a1   : > { %673 = vadd.xlane.f32.xlu1 %v672_v41 }
 0x2b2   : > { %680 = vrot.lane.b32.xlu1 %v2272_v15, %s2023_s24  ;;  %s1917_s24 = scalar_lea.vmem %s1381_s20, 128 }
 0x2b3   : > { %p1918_p0 = scmp.ne.s32.totalorder %s1381_s20, %s1917_s24 }
 0x2b5   : > { %p1919_p3 = pnand %p1918_p0, %p2172_p5 }
 0x2b7   : > { %p1920_p10 = pneg %p1919_p3 }
 0x301   : > { %v837_v42 = vpop.xlane.xlu1 %836 }
 0x302   : > { %v838_v43 = vsub.f32 %v831_v28, %v837_v42  ;;  %v1280_v28 = vld [vmem:[#allocation11] sm:$0xff] }
 0x303   : > { %1651 = vmatpush3.msra.mxu0 %v1280_v28 }
 0x304   : > { %v839_v44 = vmul.f32 1.442695, %v838_v43 }
 0x305   : > { %v1011_v45 = vpop.xlane.xlu0 %1010 }
 0x306   : > { %1769 = vpow2.f32 %v839_v44  ;;  %v1012_v46 = vsub.f32 %v1005_v31, %v1011_v45 }
 0x308   : > { %v1013_v47 = vmul.f32 1.442695, %v1012_v46 }
 0x309   : > { %v1185_v48 = vpop.xlane.xlu0 %1184 }
 0x30a   : > { %1771 = vpow2.f32 %v1013_v47  ;;  %v1186_v49 = vsub.f32 %v1179_v34, %v1185_v48 }
 0x30c   : > { %v1187_v50 = vmul.f32 1.442695, %v1186_v49 }
 0x30e   : > { %1773 = vpow2.f32 %v1187_v50 }
 0x313   : > { %v1770_v51 = vpop.eup %1769 }
 0x314   : > { %v841_v52 = vsel %vm589_vm2, %v1770_v51, 0.0 }
 0x315   : > { %842 = vadd.xlane.f32.xlu0 %v841_v52 }
 0x317   : > { %v1772_v53 = vpop.eup %1771 }
 0x318   : > { %v1015_v54 = vsel %vm589_vm2, %v1772_v53, 0.0 }
 0x319   : > { %1016 = vadd.xlane.f32.xlu1 %v1015_v54 }
 0x31b   : > { %v1774_v55 = vpop.eup %1773 }
 0x31c   : > { %v1189_v56 = vsel %vm589_vm2, %v1774_v55, 0.0 }
 0x31d   : > { %1190 = vadd.xlane.f32.xlu0 %v1189_v56 }
 0x32a   : > { %v674_v57 = vpop.xlane.xlu1 %673  ;;  %1023 = vrot.lane.b32.xlu1 %v2272_v15, %s2024_s17  ;;  %s1923_s17 = scalar_lea.vmem %s1922_s12, 256 }
 0x32b   : > { %1775 = vrcp.f32 %v674_v57  ;;  %p1925_p9 = scmp.lt.s32.totalorder %s1923_s17, %s1917_s24 }
 0x32d   : > { %p1926_p13 = por %p1925_p9, %p1924_p11 }
 0x32e   : > { %v681_v58 = vpop.permute.xlu1 %680  ;;  %1197 = vrot.lane.b32.xlu1 %v2272_v15, %s2025_s26 }
 0x32f   : > { %1610 = vmatpush3.msra.mxu1 %v681_v58  ;;  %p1927_p2 = pnand %p1926_p13, %p1920_p10 }
 0x330   : > { %1619 = vmatprep.subr.mxu1 %v2018_v0 }
 0x333   : > { %849 = vrot.lane.b32.xlu0 %v2272_v15, %s2026_s0 }
 0x338   : > { %v1776_v59 = vpop.eup %1775 }
 0x339   : > { %v676_v60 = vmul.f32 %v1776_v59, %v674_v57 }
 0x33b   : > { %v677_v61 = vsub.f32 2.0, %v676_v60 }
 0x33d   : > { %v678_v62 = vmul.f32 %v1776_v59, %v677_v61 }
 0x33f   : > { %v679_v63 = vmul.f32 %v1768_v40, %v678_v62 }
 0x341   : > { %1612 = vmatmul.mubr.msk.f32.vlgmr.msra.gmra.mxu1 %vm589_vm2, %v679_v63 }
 0x342   : > { %1621 = vmatprep.mubr.msk.f32.mxu1 %vm2019_vm0, %v2018_v0 }
 0x39e   : > { %v843_v1 = vpop.xlane.xlu0 %842 }
 0x39f   : > { %1777 = vrcp.f32 %v843_v1 }
 0x3a2   : > { %v1017_v2 = vpop.xlane.xlu1 %1016 }
 0x3a3   : > { %1779 = vrcp.f32 %v1017_v2 }
 0x3a6   : > { %v1191_v3 = vpop.xlane.xlu0 %1190  ;;  %v1024_v13 = vpop.permute.xlu1 %1023 }
 0x3a7   : > { %1781 = vrcp.f32 %v1191_v3 }
 0x3aa   : > { %v850_v4 = vpop.permute.xlu0 %849  ;;  %v1198_v20 = vpop.permute.xlu1 %1197 }
 0x3ab   : > { %1620 = vmatpush3.msra.mxu1 %v850_v4 }
 0x3ac   : > { %v1778_v5 = vpop.eup %1777  ;;  %1629 = vmatprep.subr.mxu1 %v2018_v0 }
 0x3ad   : > { %v845_v6 = vmul.f32 %v1778_v5, %v843_v1 }
 0x3af   : > { %v846_v7 = vsub.f32 2.0, %v845_v6 }
 0x3b0   : > { %v1780_v8 = vpop.eup %1779 }
 0x3b1   : > { %v847_v9 = vmul.f32 %v1778_v5, %v846_v7  ;;  %v1019_v10 = vmul.f32 %v1780_v8, %v1017_v2 }
 0x3b3   : > { %v848_v11 = vmul.f32 %v1770_v51, %v847_v9  ;;  %v1020_v12 = vsub.f32 2.0, %v1019_v10 }
 0x3b4   : > { %v1782_v14 = vpop.eup %1781 }
 0x3b5   : > { %v1021_v15 = vmul.f32 %v1780_v8, %v1020_v12  ;;  %v1193_v16 = vmul.f32 %v1782_v14, %v1191_v3  ;;  %1622 = vmatmul.mubr.msk.f32.vlgmr.msra.gmra.mxu1 %vm589_vm2, %v848_v11 }
 0x3b6   : > { %1630 = vmatpush3.msra.mxu1 %v1024_v13  ;;  %1631 = vmatprep.mubr.msk.f32.mxu1 %vm2019_vm0, %v2018_v0 }
 0x3b7   : > { %v1022_v17 = vmul.f32 %v1772_v53, %v1021_v15  ;;  %v1194_v18 = vsub.f32 2.0, %v1193_v16  ;;  %1639 = vmatprep.subr.mxu1 %v2018_v0 }
 0x3b9   : > { %v1195_v19 = vmul.f32 %v1782_v14, %v1194_v18  ;;  %1632 = vmatmul.mubr.msk.f32.vlgmr.msra.gmra.mxu1 %vm589_vm2, %v1022_v17 }
 0x3ba   : > { %1640 = vmatpush3.msra.mxu1 %v1198_v20  ;;  %1641 = vmatprep.mubr.msk.f32.mxu1 %vm2019_vm0, %v2018_v0 }
 0x3bb   : > { %v1196_v21 = vmul.f32 %v1774_v55, %v1195_v19 }
 0x3bd   : > { %1642 = vmatmul.mubr.msk.f32.vlgmr.msra.gmra.mxu1 %vm589_vm2, %v1196_v21 }
 0x401   : > { %v752_v22 = vpop.f32.mrf.mxu1 }
 0x402   : > { %756 = vst.msk [vmem:[#allocation2] sm:$0xff] %vm589_vm2, %v752_v22 }
 0x403   : > { %v1613_v23 = vpop.f32.mrf.mxu1 }
 0x475   : > { %v921_v27 = vpop.f32.mrf.mxu1 }
 0x476   : > { %926 = vrot.lane.b32.xlu0 %v921_v27, %s2027_s22 }
 0x477   : > { %v1623_v29 = vpop.f32.mrf.mxu1 }
 0x479   : > { %v1095_v30 = vpop.f32.mrf.mxu1 }
 0x47a   : > { %1100 = vrot.lane.b32.xlu1 %v1095_v30, %s2028_s23 }
 0x47b   : > { %v1633_v31 = vpop.f32.mrf.mxu1 }
 0x47d   : > { %v1269_v32 = vpop.f32.mrf.mxu1 }
 0x47e   : > { %1274 = vrot.lane.b32.xlu0 %v1269_v32, %s2029_s4 }
 0x47f   : > { %v1643_v33 = vpop.f32.mrf.mxu1 }
 0x4e8   : > { %v927_v34 = vpop.permute.xlu0 %926 }
 0x4e9   : > { %930 = vst.msk [vmem:[#allocation2] sm:$0xff] %vm929_vm3, %v927_v34 }
 0x4ec   : > { %v1101_v35 = vpop.permute.xlu1 %1100 }
 0x4ed   : > { %1104 = vst.msk [vmem:[#allocation2] sm:$0xff] %vm1103_vm4, %v1101_v35 }
 0x4f0   : > { %v1275_v0 = vpop.permute.xlu0 %1274 }
 0x4f1   : > { %1278 = vst.msk [vmem:[#allocation2] sm:$0xff] %vm1277_vm5, %v1275_v0 }
 0x4f8   : > { %v1279_v36 = vld [vmem:[#allocation2] sm:$0xff] }
 0x4f9   : > { %1653 = vmatmul.mubr.msk.f32.vlgmr.msra.gmra.mxu0 %vm431_vm1, %v1279_v36 }
 0x5b9   : > { %v1360_v38 = vpop.f32.mrf.mxu0 }
 0x5ba   : > { %v1361_v39 = vadd.f32 %v1545_v37, %v1360_v38 }
 0x5bb   : > { %v1654_v40 = vpop.f32.mrf.mxu0 }
 0x5bc   : > { %1364 = vst.msk [vmem:[%s417_s13] sm:$0xff] %vm431_vm1, %v1361_v39 }
 0x5bd   : > { %1930 = shalt.err (!%p1927_p2)
}
 0x5be   : > { %s1931_s26 = scalar_lea.hbm %s2336_s14, 128  ;;  %s1935_s22 = scalar_lea.hbm %s2387_s8, 256 }
 0x5bf   : > { %p1932_p4 = scmp.ne.s32.totalorder %s2336_s14, %s1931_s26  ;;  %p1936_p7 = scmp.lt.s32.totalorder %s2336_s14, %s2387_s8 }
 0x5c0   : > { %p1937_p6 = scmp.lt.s32.totalorder %s1935_s22, %s1931_s26 }
 0x5c1   : > { %p1933_p1 = pnand %p1932_p4, %p2172_p5 }
 0x5c2   : > { %p1938_p12 = por %p1937_p6, %p1936_p7 }
 0x5c3   : > { %p1934_p8 = pneg %p1933_p1 }
 0x5c5   : > { %p1939_p0 = pnand %p1938_p12, %p1934_p8 }
 0x5c7   : > { %1942 = shalt.err (!%p1939_p0)
}
 0x5c8   : > { %1671 = dma.vmem_to_hbm [thread:$0]  (%p2172_p5), %s1381_s20, 128, %s2336_s14, %s1366_s16  }
 0x5c9 PF: > { %s2414_s15 = sld [smem:[#allocation18_spill]]  ;;  %s1392_s19 = sand.u32 1, %s1989_s27  }
 0x5ca   : > { %p2416_p10 = scmp.ge.s32.totalorder %s2009_s10, 2  ;;  %s1393_s11 = scalar_lea.sflag [#allocation5], %s1392_s19 }
 0x5cf   : > { %p2415_p3 = scmp.ne.s32.totalorder %s2414_s15, 0 }
 0x5d1   : > { %p1691_p11 = pnand %p2416_p10, %p2415_p3 }
 0x5d3   : > { %p1692_p9 = pneg %p1691_p11 }
 0x5d5   : > { %1984 = dma.done.wait (%p1692_p9), %s1393_s11, 128  }
 0x5d6   : > { %1986 = vsyncadd (%p1692_p9), %s1393_s11, 4294967168  ;;  %s28_s10 = sadd.s32 1, %s2009_s10   ;;  %s2417_s18 = sld [smem:[#allocation19_spill]] }
 0x5d7   : > { %p25_p13 = scmp.ge.s32.totalorder %s28_s10, 4   ;;  %s2418_s27 = smov %s1993_s28 }
 0x5d8   : > { %s2419_s28 = smov %s1997_s29  ;;  %s2420_s29 = smov %s2184_s25 }
 0x5d9   : > { %s2421_s30 = smov %s2005_s9  ;;  %27 = sbr.rel (!%p25_p13) target bundleno = 14 (0xe), region = 122 }
 0x5dc   : > { %s2422_s9 = smov %s2417_s18 }
 0x5de   :  { %1398 = vsyncpa [#allocation4], 1 }
 0x5df   :  { %1400 = vsyncpa [#allocation4 + $0x1], 1 }
 0x5e0   :  { %1401 = vsyncpa [#allocation7], 1 }
 0x5e1   :  { %1403 = vsyncpa [#allocation7 + $0x1], 1 }
 0x5e2   :  { %1404 = vsyncpa [#allocation10], 1 }
 0x5e3   :  { %1405 = vsyncpa [#allocation5], 1 }
 0x5e4   :  { %1407 = vsyncpa [#allocation5 + $0x1], 1 }

</bundles_post_ra>
